<compile_context>
chip_gen: v5e
topology: v5e:2x2
jax: 0.10.0
libtpu: 0.0.40
codegen_flags: <defaults>
</compile_context>

<pallas_src>
import functools

import jax
import jax.numpy as jnp
from jax.experimental import pallas as pl
from jax.experimental.pallas import tpu as pltpu


def _round_up(n: int, m: int) -> int:
    return ((n + m - 1) // m) * m


def _classifier_kernel(x_ref, wt_ref, b_ref, o_ref, *, apply_sigmoid: bool):
    # x_ref : (TB, E) VMEM  -- one batch tile (moving MXU operand)
    # wt_ref: (E, 1)  VMEM  -- resident across all grid steps
    # b_ref : (1,)    SMEM  -- scalar bias
    # o_ref : (TB, 1) VMEM  -- logits column for this batch tile
    z = jnp.dot(x_ref[...], wt_ref[...], preferred_element_type=jnp.float32)
    z = z + b_ref[0]
    if apply_sigmoid:
        z = 1.0 / (1.0 + jnp.exp(-z))  # exact sigmoid; EUP slot is free anyway
    o_ref[...] = z.astype(o_ref.dtype)


def _xla_forward(x, w, b, algorithm):
    z = x.astype(jnp.float32) @ w.astype(jnp.float32).T + b.astype(jnp.float32)
    return jax.nn.sigmoid(z) if algorithm == "LR" else z


def _choose_batch_tile(B: int, E: int, itemsize: int, block_bytes: int) -> int:
    # Sublane multiple for this dtype (f32 -> 8, bf16 -> 16).
    sub = max(8, 32 // itemsize)
    # VMEM rows are lane-padded to 128, so budget against the padded width.
    e_lanes = _round_up(E, 128)
    tb = block_bytes // (itemsize * e_lanes)
    tb = max(sub, (tb // sub) * sub)
    # Guarantee >= 4 grid steps when B is big enough: shards the "parallel"
    # axis across both TensorCores on v7x and keeps the DMA pipeline busy.
    if B >= 4 * sub:
        tb = min(tb, _round_up(pl.cdiv(B, 4), sub))
    tb = min(tb, _round_up(B, sub))
    return max(sub, tb)


def classifier_forward(x, w, b, algorithm: str, *,
                       block_bytes: int = 4 << 20,
                       force_pallas: bool = False):
    """x: (B, E), w: (1, E) f32 (PyTorch Linear weight layout), b: (1,) f32.

    Returns (B, 1) f32, matching `Classifier.forward`.
    """
    assert algorithm in ("LR", "SVM")
    B, E = x.shape
    assert w.shape == (1, E)
    assert b.shape == (1,)

    itemsize = jnp.dtype(x.dtype).itemsize

    # Tiny problems: a fused XLA matvec beats any pallas_call launch.
    if not force_pallas and B * E * itemsize < (1 << 20):
        return _xla_forward(x, w, b, algorithm)

    tb = _choose_batch_tile(B, E, itemsize, block_bytes)
    grid = (pl.cdiv(B, tb),)  # ragged last tile; no padded copy of x

    # (E, 1) weight column in x's dtype (tiny; keeps the MXU operand types
    # matched so a bf16 x stays bf16 on the HBM-read side).
    w_t = w.astype(x.dtype).T
    b_f32 = b.astype(jnp.float32)

    kernel = functools.partial(
        _classifier_kernel, apply_sigmoid=(algorithm == "LR"))

    cost = pl.CostEstimate(
        flops=2 * B * E,
        transcendentals=B if algorithm == "LR" else 0,
        bytes_accessed=itemsize * (B * E + E) + 4 * (B + 1),
    )

    out = pl.pallas_call(
        kernel,
        out_shape=jax.ShapeDtypeStruct((B, 1), jnp.float32),
        grid=grid,
        in_specs=[
            # x: batch-tiled, double-buffered by the Pallas pipeline.
            pl.BlockSpec((tb, E), lambda i: (i, 0)),
            # w^T: constant index -> stays resident in VMEM across the grid.
            pl.BlockSpec((E, 1), lambda i: (0, 0)),
            # bias: single scalar in SMEM.
            pl.BlockSpec(memory_space=pltpu.MemorySpace.SMEM),
        ],
        out_specs=pl.BlockSpec((tb, 1), lambda i: (i, 0)),
        compiler_params=pltpu.CompilerParams(
            dimension_semantics=("parallel",),  # megacore sharding on v7x
        ),
        cost_estimate=cost,
    )(x, w_t, b_f32)

    return out


if __name__ == "__main__":
    # config.comparativeEmbedding -> choose a small hidden size of 32.
    E = 32
    key = jax.random.PRNGKey(0)
    kx, kw, kb = jax.random.split(key, 3)

    # Deterministic "nn.Linear(E, 1)" parameters (Kaiming-uniform-ish range);
    # weight kept in PyTorch layout (out_features, in_features) = (1, E).
    bound = 1.0 / float(E) ** 0.5
    w = jax.random.uniform(kw, (1, E), minval=-bound, maxval=bound,
                           dtype=jnp.float32)
    b = jax.random.uniform(kb, (1,), minval=-bound, maxval=bound,
                           dtype=jnp.float32)

    # Small batch, forced through the Pallas kernel (LR and SVM branches).
    B = 8
    x = jax.random.normal(kx, (B, E), dtype=jnp.float32)
    ref_logits = x @ w.T + b
    ref_lr = jax.nn.sigmoid(ref_logits)

    out_lr = jax.block_until_ready(
        classifier_forward(x, w, b, "LR", force_pallas=True))
    out_svm = jax.block_until_ready(
        classifier_forward(x, w, b, "SVM", force_pallas=True))
    assert out_lr.shape == (B, 1) and out_svm.shape == (B, 1)
    assert jnp.allclose(out_svm, ref_logits, atol=1e-5)
    assert jnp.allclose(out_lr, ref_lr, atol=1e-5)

    # Tiny-problem fallback path (plain XLA).
    out_fb = jax.block_until_ready(classifier_forward(x, w, b, "LR"))
    assert jnp.allclose(out_fb, ref_lr, atol=1e-5)

    # Multi-tile grid with a ragged last tile (B not a multiple of tb),
    # exercising the no-pad boundary handling.
    B2 = 300
    x2 = jax.random.normal(jax.random.PRNGKey(1), (B2, E), dtype=jnp.float32)
    out2 = jax.block_until_ready(
        classifier_forward(x2, w, b, "LR", force_pallas=True,
                           block_bytes=1 << 15))
    ref2 = jax.nn.sigmoid(x2 @ w.T + b)
    assert out2.shape == (B2, 1)
    assert jnp.allclose(out2, ref2, atol=1e-5)

    print("KERNEL_OK")
</pallas_src>

<mosaic_0001>
module attributes {stable_mosaic.version = 11 : i64} {
  func.func @_classifier_kernel(%arg0: i32, %arg1: memref<8x32xf32, #tpu.memory_space<vmem>>, %arg2: memref<32x1xf32, #tpu.memory_space<vmem>>, %arg3: memref<1xf32, #tpu.memory_space<smem>>, %arg4: memref<8x1xf32, #tpu.memory_space<vmem>>) attributes {dimension_semantics = [#tpu.dimension_semantics<parallel>], iteration_bounds = array<i64: 1>, scalar_prefetch = 0 : i64, scratch_operands = 0 : i64, tpu.core_type = #tpu.core_type<tc>, window_params = [{transform_indices = @transform_0, window_bounds = array<i64: 8, 32>}, {pipeline_mode = #tpu.pipeline_mode<synchronous>, transform_indices = @transform_1, window_bounds = array<i64: 32, 1>}, {transform_indices = @transform_2, window_bounds = array<i64: 1>}, {transform_indices = @transform_3, window_bounds = array<i64: 8, 1>}]} {
    %c0 = arith.constant 0 : index
    %c0_0 = arith.constant 0 : index
    %0 = vector.load %arg1[%c0, %c0_0] : memref<8x32xf32, #tpu.memory_space<vmem>>, vector<8x32xf32>
    %c0_1 = arith.constant 0 : index
    %c0_2 = arith.constant 0 : index
    %1 = vector.load %arg2[%c0_1, %c0_2] : memref<32x1xf32, #tpu.memory_space<vmem>>, vector<32x1xf32>
    %cst = arith.constant dense<0.000000e+00> : vector<8x1xf32>
    %2 = tpu.matmul %0, %1, %cst {dimension_numbers = #tpu.dot_dimension_numbers<[1], [0], [0], [1], [0, 0, 1, 1], [], []>} : vector<8x32xf32>, vector<32x1xf32>, vector<8x1xf32> -> vector<8x1xf32>
    %c0_3 = arith.constant 0 : index
    %3 = memref.load %arg3[%c0_3] : memref<1xf32, #tpu.memory_space<smem>>
    %4 = vector.broadcast %3 : f32 to vector<8x1xf32>
    %5 = arith.addf %2, %4 : vector<8x1xf32>
    %cst_4 = arith.constant 0.000000e+00 : f32
    %6 = vector.broadcast %cst_4 : f32 to vector<8x1xf32>
    %7 = arith.subf %6, %5 : vector<8x1xf32>
    %8 = math.exp %7 : vector<8x1xf32>
    %cst_5 = arith.constant 1.000000e+00 : f32
    %9 = vector.broadcast %cst_5 : f32 to vector<8x1xf32>
    %10 = arith.addf %9, %8 : vector<8x1xf32>
    %cst_6 = arith.constant 1.000000e+00 : f32
    %11 = vector.broadcast %cst_6 : f32 to vector<8x1xf32>
    %12 = arith.divf %11, %10 : vector<8x1xf32>
    %c0_7 = arith.constant 0 : index
    %c0_8 = arith.constant 0 : index
    %13 = vector.load %arg4[%c0_7, %c0_8] : memref<8x1xf32, #tpu.memory_space<vmem>>, vector<8x1xf32>
    tpu.vector_store %arg4[%c0_7, %c0_8], %12 {strides = array<i32>} : memref<8x1xf32, #tpu.memory_space<vmem>>, vector<8x1xf32>,
    return
  }
  func.func @transform_0(%arg0: i32) -> (i32, i32) {
    %c0_i32 = arith.constant 0 : i32
    %c0_i32_0 = arith.constant 0 : i32
    return %arg0, %c0_i32 : i32, i32
  }
  func.func @transform_1(%arg0: i32) -> (i32, i32) {
    %c0_i32 = arith.constant 0 : i32
    %c0_i32_0 = arith.constant 0 : i32
    %c0_i32_1 = arith.constant 0 : i32
    return %c0_i32, %c0_i32_0 : i32, i32
  }
  func.func @transform_2(%arg0: i32) -> i32 {
    %c0_i32 = arith.constant 0 : i32
    %c0_i32_0 = arith.constant 0 : i32
    return %c0_i32 : i32
  }
  func.func @transform_3(%arg0: i32) -> (i32, i32) {
    %c0_i32 = arith.constant 0 : i32
    %c0_i32_0 = arith.constant 0 : i32
    return %arg0, %c0_i32 : i32, i32
  }
}

</mosaic_0001>

<bundles_post_ra>
// kernel: tpu_custom_call.1
= control target key start
LH: loop header
LB: loop body
LE: loop exit
PB: predicated region body
PF: predicated region fallthrough
CT: control target
= control target key end

     0   :  { %vm22_vm0 = vcmask 261120   ;;  %vm65_vm4 = vcmask 7168   ;;  %s117_s1 = inlined_call_operand.vmem [shape: f32[32,1], index: 1, kind: input, shape index: {}]   ;;  %s118_s0 = inlined_call_operand.vmem [shape: f32[8,32], index: 0, kind: input, shape index: {}]   ;;  %s119_s2 = inlined_call_operand.<no memory space> [shape: f32[1], index: 2, kind: input, shape index: {}]   ;;  %s120_s3 = inlined_call_operand.vmem [shape: f32[8,1], index: 3, kind: output, shape index: {}]  }
   0x1   :  { %v19_v0 = vld [vmem:[%s117_s1 + $0x18] sm:$0xff]  ;;  %v18_v1 = vld [vmem:[%s117_s1 + $0x10] sm:$0xff]  ;;  %v17_v2 = vld [vmem:[%s117_s1 + $0x8] sm:$0xff]  ;;  %v21_v5 = vstv %s119_s2 }
   0x2   :  { %38 = vmatpush.msra.mxu0 %v19_v0  ;;  %v16_v3 = vld [vmem:[%s117_s1] sm:$0xff] }
   0x3   :  { %v15_v4 = vld [vmem:[%s118_s0] sm:$0xff] }
   0x4   :  { %39 = vmatpush.msra.mxu0 %v18_v1 }
   0x6   :  { %40 = vmatpush.msra.mxu0 %v17_v2 }
   0x8   :  { %41 = vmatpush.msra.mxu0 %v16_v3 }
   0x9   :  { %71 = vmatmul.msk.f32.vlgmr.msra.gmra.mxu0 %vm22_vm0, %v15_v4 }
  0x86   :  { %v43_v6 = vpop.f32.mrf.mxu0 }
  0x87   :  { %v44_v7 = vadd.f32 %v43_v6, %v21_v5 }
  0x89   :  { %v46_v8 = vsub.f32 0.0, %v44_v7 }
  0x8b   :  { %v47_v9 = vmul.f32 1.442695, %v46_v8 }
  0x8d   :  { %72 = vpow2.f32 %v47_v9 }
  0x93   :  { %v73_v10 = vpop.eup %72 }
  0x94   :  { %v49_v11 = vadd.f32 1.0, %v73_v10 }
  0x96   :  { %74 = vrcp.f32 %v49_v11  ;;  %v61_v15 = vand.u32 2147483648, %v49_v11  ;;  %v59_v17 = vand.u32 2147483647, %v49_v11  ;;  %vm55_vm2 = vweird.f32 %v49_v11 }
  0x98   :  { %v62_v19 = vor.u32 1.1754944e-38, %v61_v15  ;;  %vm60_vm5 = vcmp.eq.f32.partialorder %v59_v17, 8.507059e+37 }
  0x9c   :  { %v75_v12 = vpop.eup %74 }
  0x9d   :  { %v51_v13 = vmul.f32 %v75_v12, %v49_v11  ;;  %vm56_vm1 = vweird.f32 %v75_v12 }
  0x9e   :  { %vm57_vm3 = vmor %vm55_vm2, %vm56_vm1 }
  0x9f   :  { %v52_v14 = vsub.f32 1.0, %v51_v13 }
  0xa1   :  { %v53_v16 = vmul.f32 %v75_v12, %v52_v14 }
  0xa3   :  { %v54_v18 = vadd.f32 %v75_v12, %v53_v16 }
  0xa5   :  { %v58_v20 = vsel %vm57_vm3, %v75_v12, %v54_v18 }
  0xa6   :  { %v63_v21 = vsel %vm60_vm5, %v62_v19, %v58_v20 }
  0xa7   :  { %66 = vst.msk [vmem:[%s120_s3] sm:$0xff] %vm65_vm4, %v63_v21 }

</bundles_post_ra>
